<compile_context>
chip_gen: v6e
topology: v6e:2x2x1
jax: 0.10.0
libtpu: 0.0.40
codegen_flags: <defaults>
</compile_context>

<pallas_src>
import jax
import jax.numpy as jnp
from jax.experimental import pallas as pl
from jax.experimental.pallas import tpu as pltpu

NUM_LAYERS = 5
MAIN_VALUES = (10000.0, 1000.0, 1.0, 10.0, 10000.0)
FEAT = 4
LANE = 128
DEFAULT_TILE_N = 1024  # lane-axis (batch) tile; double-buffered in+out = 64 KiB VMEM


def _build_weights() -> jnp.ndarray:
    """Deterministic weight construction matching the PyTorch __init__."""
    ws = []
    for mv in MAIN_VALUES:
        w = jnp.arange(0, FEAT * FEAT, dtype=jnp.float32).reshape(FEAT, FEAT)
        w = w.at[-1, -1].set(mv)
        ws.append(w)  # effective matmul matrix (nn.Linear transposes it back)
    return jnp.stack(ws, axis=0)  # [5, 4, 4]


def _round_up(x: int, m: int) -> int:
    return ((x + m - 1) // m) * m


def seq_matmul_kernel(w_ref, xT_ref, oT_ref):
    # w_ref : (4, 4) f32 in SMEM  -- combined weight W_c, out = x @ W_c
    # xT_ref: (4, TILE) f32 VMEM  -- activations transposed (feature x batch-lane)
    # oT_ref: (4, TILE) f32 VMEM  -- output transposed
    #
    # O^T[j, :] = sum_k W_c[k, j] * X^T[k, :]   (16 scalar-broadcast VPU FMAs)
    x_rows = [xT_ref[k:k + 1, :] for k in range(FEAT)]  # four (1, TILE) loads
    for j in range(FEAT):
        acc = w_ref[0, j] * x_rows[0]
        for k in range(1, FEAT):
            acc = acc + w_ref[k, j] * x_rows[k]
        oT_ref[j:j + 1, :] = acc  # full-width, lane-dense store


def sequential_matmul(x: jnp.ndarray, w_stack: jnp.ndarray,
                      tile_n: int = DEFAULT_TILE_N) -> jnp.ndarray:
    n, f = x.shape
    assert f == FEAT
    # Fuse the 5 weights into a single 4x4 matrix (kept in f32; do NOT use
    # bf16 here -- the 1e4-scale main_values would blow the tolerance).
    w_c = w_stack[0]
    for i in range(1, NUM_LAYERS):
        w_c = jnp.matmul(w_c, w_stack[i], precision=jax.lax.Precision.HIGHEST)

    # Pad the batch to a lane-friendly size and transpose so batch is the
    # (lane-dense) last dimension.
    n_pad = max(_round_up(n, LANE), LANE)
    if n_pad <= tile_n:
        tile = n_pad
    else:
        tile = tile_n
        n_pad = _round_up(n, tile)
    x_pad = jnp.pad(x, ((0, n_pad - n), (0, 0)))
    xT = x_pad.T  # (4, n_pad)

    oT = pl.pallas_call(
        seq_matmul_kernel,
        out_shape=jax.ShapeDtypeStruct((FEAT, n_pad), jnp.float32),
        grid=(n_pad // tile,),
        in_specs=[
            pl.BlockSpec(memory_space=pltpu.MemorySpace.SMEM),  # 4x4 weights
            pl.BlockSpec((FEAT, tile), lambda i: (0, i)),
        ],
        out_specs=pl.BlockSpec((FEAT, tile), lambda i: (0, i)),
        compiler_params=pltpu.CompilerParams(
            dimension_semantics=("parallel",)),
    )(w_c, xT)
    return oT.T[:n]


def reference(x: jnp.ndarray, w_stack: jnp.ndarray) -> jnp.ndarray:
    out = x
    for i in range(NUM_LAYERS):
        out = jnp.matmul(out, w_stack[i], precision=jax.lax.Precision.HIGHEST)
    return out


if __name__ == "__main__":
    key = jax.random.PRNGKey(0)
    batch = 8
    x = jax.random.normal(key, (batch, FEAT), dtype=jnp.float32)
    w_stack = _build_weights()

    out = sequential_matmul(x, w_stack)
    out = jax.block_until_ready(out)

    ref = reference(x, w_stack)
    assert out.shape == (batch, FEAT)
    assert jnp.allclose(out, ref, rtol=1e-5, atol=1e-3), "mismatch vs reference"
    print("KERNEL_OK")
</pallas_src>

<mosaic_0001>
module attributes {stable_mosaic.version = 11 : i64} {
  func.func @seq_matmul_kernel(%arg0: i32, %arg1: memref<4x4xf32, #tpu.memory_space<smem>>, %arg2: memref<4x128xf32, #tpu.memory_space<vmem>>, %arg3: memref<4x128xf32, #tpu.memory_space<vmem>>) attributes {dimension_semantics = [#tpu.dimension_semantics<parallel>], iteration_bounds = array<i64: 1>, scalar_prefetch = 0 : i64, scratch_operands = 0 : i64, tpu.core_type = #tpu.core_type<tc>, window_params = [{transform_indices = @transform_0, window_bounds = array<i64: 4, 4>}, {transform_indices = @transform_1, window_bounds = array<i64: 4, 128>}, {transform_indices = @transform_2, window_bounds = array<i64: 4, 128>}]} {
    %c0 = arith.constant 0 : index
    %c0_0 = arith.constant 0 : index
    %0 = vector.load %arg2[%c0, %c0_0] : memref<4x128xf32, #tpu.memory_space<vmem>>, vector<1x128xf32>
    %c1 = arith.constant 1 : index
    %c0_1 = arith.constant 0 : index
    %1 = vector.load %arg2[%c1, %c0_1] : memref<4x128xf32, #tpu.memory_space<vmem>>, vector<1x128xf32>
    %c2 = arith.constant 2 : index
    %c0_2 = arith.constant 0 : index
    %2 = vector.load %arg2[%c2, %c0_2] : memref<4x128xf32, #tpu.memory_space<vmem>>, vector<1x128xf32>
    %c3 = arith.constant 3 : index
    %c0_3 = arith.constant 0 : index
    %3 = vector.load %arg2[%c3, %c0_3] : memref<4x128xf32, #tpu.memory_space<vmem>>, vector<1x128xf32>
    %c0_4 = arith.constant 0 : index
    %c0_5 = arith.constant 0 : index
    %4 = memref.load %arg1[%c0_4, %c0_5] : memref<4x4xf32, #tpu.memory_space<smem>>
    %5 = vector.broadcast %4 : f32 to vector<1x128xf32>
    %6 = arith.mulf %5, %0 : vector<1x128xf32>
    %c1_6 = arith.constant 1 : index
    %c0_7 = arith.constant 0 : index
    %7 = memref.load %arg1[%c1_6, %c0_7] : memref<4x4xf32, #tpu.memory_space<smem>>
    %8 = vector.broadcast %7 : f32 to vector<1x128xf32>
    %9 = arith.mulf %8, %1 : vector<1x128xf32>
    %10 = arith.addf %6, %9 : vector<1x128xf32>
    %c2_8 = arith.constant 2 : index
    %c0_9 = arith.constant 0 : index
    %11 = memref.load %arg1[%c2_8, %c0_9] : memref<4x4xf32, #tpu.memory_space<smem>>
    %12 = vector.broadcast %11 : f32 to vector<1x128xf32>
    %13 = arith.mulf %12, %2 : vector<1x128xf32>
    %14 = arith.addf %10, %13 : vector<1x128xf32>
    %c3_10 = arith.constant 3 : index
    %c0_11 = arith.constant 0 : index
    %15 = memref.load %arg1[%c3_10, %c0_11] : memref<4x4xf32, #tpu.memory_space<smem>>
    %16 = vector.broadcast %15 : f32 to vector<1x128xf32>
    %17 = arith.mulf %16, %3 : vector<1x128xf32>
    %18 = arith.addf %14, %17 : vector<1x128xf32>
    %c0_12 = arith.constant 0 : index
    %c0_13 = arith.constant 0 : index
    %19 = vector.load %arg3[%c0_12, %c0_13] : memref<4x128xf32, #tpu.memory_space<vmem>>, vector<1x128xf32>
    tpu.vector_store %arg3[%c0_12, %c0_13], %18 {strides = array<i32>} : memref<4x128xf32, #tpu.memory_space<vmem>>, vector<1x128xf32>,
    %c0_14 = arith.constant 0 : index
    %c1_15 = arith.constant 1 : index
    %20 = memref.load %arg1[%c0_14, %c1_15] : memref<4x4xf32, #tpu.memory_space<smem>>
    %21 = vector.broadcast %20 : f32 to vector<1x128xf32>
    %22 = arith.mulf %21, %0 : vector<1x128xf32>
    %c1_16 = arith.constant 1 : index
    %c1_17 = arith.constant 1 : index
    %23 = memref.load %arg1[%c1_16, %c1_17] : memref<4x4xf32, #tpu.memory_space<smem>>
    %24 = vector.broadcast %23 : f32 to vector<1x128xf32>
    %25 = arith.mulf %24, %1 : vector<1x128xf32>
    %26 = arith.addf %22, %25 : vector<1x128xf32>
    %c2_18 = arith.constant 2 : index
    %c1_19 = arith.constant 1 : index
    %27 = memref.load %arg1[%c2_18, %c1_19] : memref<4x4xf32, #tpu.memory_space<smem>>
    %28 = vector.broadcast %27 : f32 to vector<1x128xf32>
    %29 = arith.mulf %28, %2 : vector<1x128xf32>
    %30 = arith.addf %26, %29 : vector<1x128xf32>
    %c3_20 = arith.constant 3 : index
    %c1_21 = arith.constant 1 : index
    %31 = memref.load %arg1[%c3_20, %c1_21] : memref<4x4xf32, #tpu.memory_space<smem>>
    %32 = vector.broadcast %31 : f32 to vector<1x128xf32>
    %33 = arith.mulf %32, %3 : vector<1x128xf32>
    %34 = arith.addf %30, %33 : vector<1x128xf32>
    %c1_22 = arith.constant 1 : index
    %c0_23 = arith.constant 0 : index
    %35 = vector.load %arg3[%c1_22, %c0_23] : memref<4x128xf32, #tpu.memory_space<vmem>>, vector<1x128xf32>
    tpu.vector_store %arg3[%c1_22, %c0_23], %34 {strides = array<i32>} : memref<4x128xf32, #tpu.memory_space<vmem>>, vector<1x128xf32>,
    %c0_24 = arith.constant 0 : index
    %c2_25 = arith.constant 2 : index
    %36 = memref.load %arg1[%c0_24, %c2_25] : memref<4x4xf32, #tpu.memory_space<smem>>
    %37 = vector.broadcast %36 : f32 to vector<1x128xf32>
    %38 = arith.mulf %37, %0 : vector<1x128xf32>
    %c1_26 = arith.constant 1 : index
    %c2_27 = arith.constant 2 : index
    %39 = memref.load %arg1[%c1_26, %c2_27] : memref<4x4xf32, #tpu.memory_space<smem>>
    %40 = vector.broadcast %39 : f32 to vector<1x128xf32>
    %41 = arith.mulf %40, %1 : vector<1x128xf32>
    %42 = arith.addf %38, %41 : vector<1x128xf32>
    %c2_28 = arith.constant 2 : index
    %c2_29 = arith.constant 2 : index
    %43 = memref.load %arg1[%c2_28, %c2_29] : memref<4x4xf32, #tpu.memory_space<smem>>
    %44 = vector.broadcast %43 : f32 to vector<1x128xf32>
    %45 = arith.mulf %44, %2 : vector<1x128xf32>
    %46 = arith.addf %42, %45 : vector<1x128xf32>
    %c3_30 = arith.constant 3 : index
    %c2_31 = arith.constant 2 : index
    %47 = memref.load %arg1[%c3_30, %c2_31] : memref<4x4xf32, #tpu.memory_space<smem>>
    %48 = vector.broadcast %47 : f32 to vector<1x128xf32>
    %49 = arith.mulf %48, %3 : vector<1x128xf32>
    %50 = arith.addf %46, %49 : vector<1x128xf32>
    %c2_32 = arith.constant 2 : index
    %c0_33 = arith.constant 0 : index
    %51 = vector.load %arg3[%c2_32, %c0_33] : memref<4x128xf32, #tpu.memory_space<vmem>>, vector<1x128xf32>
    tpu.vector_store %arg3[%c2_32, %c0_33], %50 {strides = array<i32>} : memref<4x128xf32, #tpu.memory_space<vmem>>, vector<1x128xf32>,
    %c0_34 = arith.constant 0 : index
    %c3_35 = arith.constant 3 : index
    %52 = memref.load %arg1[%c0_34, %c3_35] : memref<4x4xf32, #tpu.memory_space<smem>>
    %53 = vector.broadcast %52 : f32 to vector<1x128xf32>
    %54 = arith.mulf %53, %0 : vector<1x128xf32>
    %c1_36 = arith.constant 1 : index
    %c3_37 = arith.constant 3 : index
    %55 = memref.load %arg1[%c1_36, %c3_37] : memref<4x4xf32, #tpu.memory_space<smem>>
    %56 = vector.broadcast %55 : f32 to vector<1x128xf32>
    %57 = arith.mulf %56, %1 : vector<1x128xf32>
    %58 = arith.addf %54, %57 : vector<1x128xf32>
    %c2_38 = arith.constant 2 : index
    %c3_39 = arith.constant 3 : index
    %59 = memref.load %arg1[%c2_38, %c3_39] : memref<4x4xf32, #tpu.memory_space<smem>>
    %60 = vector.broadcast %59 : f32 to vector<1x128xf32>
    %61 = arith.mulf %60, %2 : vector<1x128xf32>
    %62 = arith.addf %58, %61 : vector<1x128xf32>
    %c3_40 = arith.constant 3 : index
    %c3_41 = arith.constant 3 : index
    %63 = memref.load %arg1[%c3_40, %c3_41] : memref<4x4xf32, #tpu.memory_space<smem>>
    %64 = vector.broadcast %63 : f32 to vector<1x128xf32>
    %65 = arith.mulf %64, %3 : vector<1x128xf32>
    %66 = arith.addf %62, %65 : vector<1x128xf32>
    %c3_42 = arith.constant 3 : index
    %c0_43 = arith.constant 0 : index
    %67 = vector.load %arg3[%c3_42, %c0_43] : memref<4x128xf32, #tpu.memory_space<vmem>>, vector<1x128xf32>
    tpu.vector_store %arg3[%c3_42, %c0_43], %66 {strides = array<i32>} : memref<4x128xf32, #tpu.memory_space<vmem>>, vector<1x128xf32>,
    return
  }
  func.func @transform_0(%arg0: i32) -> (i32, i32) {
    %c0_i32 = arith.constant 0 : i32
    %c0_i32_0 = arith.constant 0 : i32
    %c0_i32_1 = arith.constant 0 : i32
    return %c0_i32, %c0_i32_0 : i32, i32
  }
  func.func @transform_1(%arg0: i32) -> (i32, i32) {
    %c0_i32 = arith.constant 0 : i32
    %c0_i32_0 = arith.constant 0 : i32
    return %c0_i32, %arg0 : i32, i32
  }
  func.func @transform_2(%arg0: i32) -> (i32, i32) {
    %c0_i32 = arith.constant 0 : i32
    %c0_i32_0 = arith.constant 0 : i32
    return %c0_i32, %arg0 : i32, i32
  }
}

</mosaic_0001>

<bundles_post_ra>
// kernel: tpu_custom_call.1
= control target key start
LH: loop header
LB: loop body
LE: loop exit
PB: predicated region body
PF: predicated region fallthrough
CT: control target
= control target key end

     0   :  { %7 = vsyncpa [#allocation5], 0  ;;  %s218_s0 = inlined_call_operand.hbm [shape: f32[4,4], index: 0, kind: input, shape index: {}]   ;;  %s219_s1 = inlined_call_operand.hbm [shape: f32[4,128], index: 1, kind: input, shape index: {}]   ;;  %s220_s2 = inlined_call_operand.hbm [shape: f32[4,128], index: 2, kind: output, shape index: {}]  }
   0x1   :  { %8 = vsyncpa [#allocation3], 0 }
   0x2   :  { %9 = vsyncpa [#allocation4], 0  ;;  %s191_s9 = smov [#allocation2]   ;;  %s192_s12 = smov [#allocation6]  }
   0x3   :  { %17 = dma.hbm_to_smem %s218_s0, 64, %s191_s9, [#allocation5]  }
   0x4   :  { %s24_s13 = sshll.u32 %s192_s12, 4  ;;  %s25_s13 = int_to_ptr.vmem [resolvable:$true] %s24_s13 }
   0x5   :  { %s153_s14 = scalar_lea.vmem %s25_s13, 64  ;;  %p158_p1 = scmp.lt.s32.totalorder %s25_s13, %s25_s13 }
   0x6   :  { %p154_p0 = scmp.ne.s32.totalorder %s25_s13, %s153_s14  ;;  %p159_p2 = scmp.lt.s32.totalorder %s153_s14, %s153_s14 }
   0x8   :  { %p160_p3 = por %p159_p2, %p158_p1 }
   0xa   :  { %p161_p4 = pnand %p160_p3, %p154_p0 }
   0xc   :  { %164 = shalt.err (!%p161_p4)
}
   0xd   :  { %27 = dma.hbm_to_vmem [thread:$0]  %s219_s1, 64, %s25_s13, [#allocation3]  }
   0xe   :  { %185 = dma.done.wait [#allocation5], 64  }
   0xf   :  { %186 = vsyncadd [#allocation5], 4294967232 }
  0x10   :  { %187 = dma.done.wait [#allocation3], 64  }
  0x11   :  { %188 = vsyncadd [#allocation3], 4294967232 }
  0x12   :  { %34 = sfence }
  0x13   :  { %s39_s0 = sld [smem:[#allocation2]]  ;;  %v35_v0 = vld [vmem:[#allocation6] sm:$0x1]  ;;  %v36_v1 = vld [vmem:[#allocation6 + $0x1] sm:$0x1]  ;;  %s193_s3 = smov [#allocation7]  }
  0x14   :  { %s119_s17 = sld [smem:[#allocation2 + $0x80]]  ;;  %v37_v2 = vld [vmem:[#allocation6 + $0x2] sm:$0x1]  ;;  %v38_v4 = vld [vmem:[#allocation6 + $0x3] sm:$0x1]  ;;  %s109_s4 = sshll.u32 %s193_s3, 4  ;;  %s110_s4 = int_to_ptr.vmem [resolvable:$true] %s109_s4 }
  0x15   :  { %s120_s18 = sld [smem:[#allocation2 + $0x100]]  ;;  %s165_s5 = scalar_lea.vmem %s110_s4, 64 }
  0x16   :  { %s121_s19 = sld [smem:[#allocation2 + $0x180]]  ;;  %p166_p5 = scmp.ne.s32.totalorder %s110_s4, %s165_s5 }
  0x17   :  { %s122_s20 = sld [smem:[#allocation2 + $0x1]]  ;;  %p170_p6 = scmp.lt.s32.totalorder %s110_s4, %s110_s4 }
  0x18   :  { %s123_s21 = sld [smem:[#allocation2 + $0x81]]  ;;  %p171_p7 = scmp.lt.s32.totalorder %s165_s5, %s165_s5 }
  0x19   :  { %v40_v3 = vstv %s39_s0  ;;  %s124_s22 = sld [smem:[#allocation2 + $0x101]] }
  0x1a   :  { %v41_v5 = vmul.f32 %v40_v3, %v35_v0  ;;  %v43_v6 = vstv %s119_s17  ;;  %s125_s1 = sld [smem:[#allocation2 + $0x181]]  ;;  %p172_p8 = por %p171_p7, %p170_p6 }
  0x1b   :  { %v44_v7 = vmul.f32 %v43_v6, %v36_v1  ;;  %v47_v8 = vstv %s120_s18  ;;  %s126_s23 = sld [smem:[#allocation2 + $0x2]] }
  0x1c   :  { %v48_v9 = vmul.f32 %v47_v8, %v37_v2  ;;  %v51_v10 = vstv %s121_s19  ;;  %s127_s24 = sld [smem:[#allocation2 + $0x82]]  ;;  %p173_p9 = pnand %p172_p8, %p166_p5 }
  0x1d   :  { %v45_v11 = vadd.f32 %v44_v7, %v41_v5  ;;  %v52_v12 = vmul.f32 %v51_v10, %v38_v4  ;;  %v56_v13 = vstv %s122_s20  ;;  %s128_s25 = sld [smem:[#allocation2 + $0x102]] }
  0x1e   :  { %v57_v14 = vmul.f32 %v56_v13, %v35_v0  ;;  %v59_v15 = vstv %s123_s21  ;;  %s129_s26 = sld [smem:[#allocation2 + $0x182]] }
  0x1f   :  { %v49_v16 = vadd.f32 %v48_v9, %v45_v11  ;;  %v60_v17 = vmul.f32 %v59_v15, %v36_v1  ;;  %v63_v18 = vstv %s124_s22  ;;  %s130_s27 = sld [smem:[#allocation2 + $0x3]] }
  0x20   :  { %v64_v19 = vmul.f32 %v63_v18, %v37_v2  ;;  %v67_v20 = vstv %s125_s1  ;;  %s131_s28 = sld [smem:[#allocation2 + $0x83]] }
  0x21   :  { %v53_v21 = vadd.f32 %v52_v12, %v49_v16  ;;  %v61_v22 = vadd.f32 %v60_v17, %v57_v14  ;;  %v68_v23 = vmul.f32 %v67_v20, %v38_v4  ;;  %v72_v24 = vstv %s126_s23  ;;  %s132_s29 = sld [smem:[#allocation2 + $0x103]] }
  0x22   :  { %v73_v25 = vmul.f32 %v72_v24, %v35_v0  ;;  %v75_v26 = vstv %s127_s24  ;;  %s133_s30 = sld [smem:[#allocation2 + $0x183]] }
  0x23   :  { %54 = vst [vmem:[#allocation7] sm:$0x1] %v53_v21  ;;  %v65_v27 = vadd.f32 %v64_v19, %v61_v22  ;;  %v76_v28 = vmul.f32 %v75_v26, %v36_v1  ;;  %v79_v29 = vstv %s128_s25 }
  0x24   :  { %v80_v30 = vmul.f32 %v79_v29, %v37_v2  ;;  %v83_v31 = vstv %s129_s26 }
  0x25   :  { %v69_v32 = vadd.f32 %v68_v23, %v65_v27  ;;  %v77_v33 = vadd.f32 %v76_v28, %v73_v25  ;;  %v84_v34 = vmul.f32 %v83_v31, %v38_v4  ;;  %v88_v35 = vstv %s130_s27 }
  0x26   :  { %v89_v36 = vmul.f32 %v88_v35, %v35_v0  ;;  %v91_v37 = vstv %s131_s28 }
  0x27   :  { %70 = vst [vmem:[#allocation7 + $0x1] sm:$0x1] %v69_v32  ;;  %v81_v38 = vadd.f32 %v80_v30, %v77_v33  ;;  %v92_v39 = vmul.f32 %v91_v37, %v36_v1  ;;  %v95_v40 = vstv %s132_s29 }
  0x28   :  { %v96_v41 = vmul.f32 %v95_v40, %v37_v2  ;;  %v99_v42 = vstv %s133_s30 }
  0x29   :  { %v85_v43 = vadd.f32 %v84_v34, %v81_v38  ;;  %v93_v44 = vadd.f32 %v92_v39, %v89_v36  ;;  %v100_v45 = vmul.f32 %v99_v42, %v38_v4 }
  0x2b   :  { %86 = vst [vmem:[#allocation7 + $0x2] sm:$0x1] %v85_v43  ;;  %v97_v46 = vadd.f32 %v96_v41, %v93_v44 }
  0x2d   :  { %v101_v47 = vadd.f32 %v100_v45, %v97_v46 }
  0x2f   :  { %102 = vst [vmem:[#allocation7 + $0x3] sm:$0x1] %v101_v47 }
  0x30   :  { %176 = shalt.err (!%p173_p9)
}
  0x31   :  { %112 = dma.vmem_to_hbm [thread:$0]  %s110_s4, 64, %s220_s2, [#allocation4]  }
  0x32   :  { %189 = dma.done.wait [#allocation4], 64  }
  0x33   :  { %190 = vsyncadd [#allocation4], 4294967232 }
  0x34   :  { %116 = vsyncpa [#allocation3], 1 }
  0x35   :  { %117 = vsyncpa [#allocation4], 1 }
  0x36   :  { %118 = vsyncpa [#allocation5], 1 }

</bundles_post_ra>
